<compile_context>
chip_gen: v5e
topology: v5e:2x2
jax: 0.10.0
libtpu: 0.0.40
codegen_flags: <defaults>
</compile_context>

<pallas_src>
import jax
import jax.numpy as jnp
from jax.experimental import pallas as pl
from jax.experimental.pallas import tpu as pltpu


def _round_up(x, m):
    return ((x + m - 1) // m) * m


def _proto_matmul_kernel(x_ref, w_ref, o_ref):
    # One MXU matmul per grid step: (bm, D) @ (D, tn) with f32 accumulation.
    o_ref[...] = jnp.dot(
        x_ref[...], w_ref[...], preferred_element_type=jnp.float32
    ).astype(o_ref.dtype)


# Conservative per-generation VMEM budget for pipelined buffers: fits v5e/v6e
# scoped defaults once vmem_limit_bytes is raised, and leaves headroom on
# v7x's 64 MiB physical VMEM.
_DEFAULT_VMEM_BUDGET = 28 * 1024 * 1024


def _select_tiles(B, D, K_pad, x_bytes, w_bytes, o_bytes, budget):
    """Pick (bm, tn, whole_weight) so the pipelined buffers fit `budget`."""
    if B >= 512:
        bm_cands = [512, 256, 128]
    elif B >= 256:
        bm_cands = [256, 128]
    elif B >= 128:
        bm_cands = [128]
    else:
        bm_cands = [_round_up(B, 8)]
    tn_cands = [1024, 512, 256, 128]

    for bm in bm_cands:
        x_buf = 2 * bm * D * x_bytes  # double-buffered x tile
        # Whole-weight resident: single weight buffer (constant index_map).
        whole = D * K_pad * w_bytes + x_buf + 2 * bm * K_pad * o_bytes
        if whole <= budget:
            return bm, K_pad, True
        for tn_c in tn_cands:
            tn = min(tn_c, K_pad)
            used = x_buf + 2 * D * tn * w_bytes + 2 * bm * tn * o_bytes
            if used <= budget:
                return bm, tn, False
    # Nothing fit the budget: fall back to the smallest sane tiles; the
    # vmem_limit below is derived from the actual buffer sum with headroom.
    return min(bm_cands[-1], 128), min(128, K_pad), False


def fused_prototypes(x, w_cat, *, out_dtype=jnp.float32,
                     compute_dtype=jnp.bfloat16, force_pallas=False,
                     vmem_budget_bytes=_DEFAULT_VMEM_BUDGET):
    """x: (B, D), w_cat: (D, K_pad) with K_pad % 128 == 0 -> (B, K_pad)."""
    B, D = x.shape
    D2, K_pad = w_cat.shape
    assert D == D2, "feature dim mismatch"
    assert K_pad % 128 == 0, "fused K must be padded to a multiple of 128"

    x_c = x.astype(compute_dtype)
    w_c = w_cat.astype(compute_dtype)

    # Tiny problems: launch + DMA setup dominates; one XLA dot is faster.
    if not force_pallas and (B * D * K_pad) < (1 << 21):
        return jnp.dot(x_c, w_c, preferred_element_type=jnp.float32).astype(out_dtype)

    x_bytes = jnp.dtype(compute_dtype).itemsize
    w_bytes = jnp.dtype(compute_dtype).itemsize
    o_bytes = jnp.dtype(out_dtype).itemsize
    bm, tn, whole_weight = _select_tiles(
        B, D, K_pad, x_bytes, w_bytes, o_bytes, vmem_budget_bytes)

    nb = pl.cdiv(B, bm)
    nk = pl.cdiv(K_pad, tn)

    cost = pl.CostEstimate(
        flops=2 * B * D * K_pad,
        transcendentals=0,
        bytes_accessed=B * D * x_bytes + D * K_pad * w_bytes + B * K_pad * o_bytes,
    )

    if whole_weight:
        # 1-D grid over batch tiles; weight is VMEM-resident, single-buffered
        # (its index_map is constant, so double-buffering it is pure waste).
        n_w_buf = 1
        grid = (nb,)
        in_specs = [
            pl.BlockSpec((bm, D), lambda i: (i, 0)),
            pl.BlockSpec((D, K_pad), lambda i: (0, 0),
                         pipeline_mode=pl.Buffered(1)),
        ]
        out_specs = pl.BlockSpec((bm, K_pad), lambda i: (i, 0))
        dims = ("parallel",)
    else:
        n_w_buf = 2
        # Order the grid so the larger streamed operand is re-read fewest
        # times: K-outer re-streams x (nk times); B-outer re-streams w (nb times).
        k_outer = B * D * (nk - 1) * x_bytes < D * K_pad * (nb - 1) * w_bytes
        if k_outer:
            grid = (nk, nb)
            in_specs = [
                pl.BlockSpec((bm, D), lambda k, b: (b, 0)),
                pl.BlockSpec((D, tn), lambda k, b: (0, k)),
            ]
            out_specs = pl.BlockSpec((bm, tn), lambda k, b: (b, k))
        else:
            grid = (nb, nk)
            in_specs = [
                pl.BlockSpec((bm, D), lambda b, k: (b, 0)),
                pl.BlockSpec((D, tn), lambda b, k: (0, k)),
            ]
            out_specs = pl.BlockSpec((bm, tn), lambda b, k: (b, k))
        dims = ("parallel", "parallel")

    w_tile = K_pad if whole_weight else tn
    buf_bytes = (2 * bm * D * x_bytes
                 + n_w_buf * D * w_tile * w_bytes
                 + 2 * bm * w_tile * o_bytes)
    vmem_limit = min(int(buf_bytes * 1.5) + (4 << 20), 64 << 20)

    return pl.pallas_call(
        _proto_matmul_kernel,
        out_shape=jax.ShapeDtypeStruct((B, K_pad), out_dtype),
        grid=grid,
        in_specs=in_specs,
        out_specs=out_specs,
        compiler_params=pltpu.CompilerParams(
            dimension_semantics=dims,
            vmem_limit_bytes=vmem_limit,
        ),
        cost_estimate=cost,
    )(x_c, w_c)


class MultiPrototypes:
    """JAX/Pallas port of the PyTorch MultiPrototypes module (fused heads)."""

    def __init__(self, output_dim, nmb_prototypes, key, *,
                 compute_dtype=jnp.bfloat16, out_dtype=jnp.float32,
                 force_pallas=False):
        self.nmb_heads = len(nmb_prototypes)
        self.output_dim = output_dim
        self.nmb_prototypes = list(nmb_prototypes)
        self.compute_dtype = compute_dtype
        self.out_dtype = out_dtype
        self.force_pallas = force_pallas

        # Per-head weights in PyTorch nn.Linear layout (k_i, D), f32 master
        # copy, initialized like nn.Linear: U(-1/sqrt(D), 1/sqrt(D)).
        keys = jax.random.split(key, max(self.nmb_heads, 1))
        bound = 1.0 / float(output_dim) ** 0.5
        self.weights = [
            jax.random.uniform(subkey, (k_i, output_dim), dtype=jnp.float32,
                               minval=-bound, maxval=bound)
            for k_i, subkey in zip(self.nmb_prototypes, keys)
        ]

        # Fused, pre-transposed weight built ONCE: each head padded to a
        # 128-lane boundary (so per-head slices of the fused output start on
        # lane boundaries -> no relayout copies), stored in the MXU-native
        # compute dtype (bf16 by default). Padded columns are never read back.
        blocks, offsets, acc = [], [], 0
        for w, k_i in zip(self.weights, self.nmb_prototypes):
            k_aligned = _round_up(k_i, 128)
            wt = jnp.transpose(w)                                  # (D, k_i)
            wt = jnp.pad(wt, ((0, 0), (0, k_aligned - k_i)))       # (D, k_aligned)
            blocks.append(wt)
            offsets.append(acc)
            acc += k_aligned
        self.k_pad = acc
        self.offsets = offsets
        self.w_cat = jnp.concatenate(blocks, axis=1).astype(compute_dtype)

    def __call__(self, x):
        fused = fused_prototypes(
            x, self.w_cat,
            out_dtype=self.out_dtype,
            compute_dtype=self.compute_dtype,
            force_pallas=self.force_pallas,
        )  # (B, K_pad), one kernel launch for all heads
        # Lane-aligned slices: every head starts at a multiple of 128 columns.
        return [fused[:, off:off + k_i]
                for off, k_i in zip(self.offsets, self.nmb_prototypes)]


if __name__ == "__main__":
    key = jax.random.PRNGKey(0)
    k_x, k_params = jax.random.split(key)

    batch = 16
    output_dim = 64
    nmb_prototypes = [30, 50, 100]

    x = jax.random.normal(k_x, (batch, output_dim), dtype=jnp.float32)

    # force_pallas=True so the Pallas kernel (whole-weight-resident path)
    # actually runs at this small test size instead of the XLA short-circuit.
    model = MultiPrototypes(output_dim, nmb_prototypes, k_params,
                            force_pallas=True)
    outs = model(x)
    outs = [jax.block_until_ready(o) for o in outs]

    # Also exercise the K-tiled (2-D grid) code path by forcing a tiny budget.
    fused_tiled = fused_prototypes(x, model.w_cat, out_dtype=jnp.float32,
                                   force_pallas=True,
                                   vmem_budget_bytes=64 * 1024)
    fused_tiled = jax.block_until_ready(fused_tiled)

    # Sanity check against the plain f32 reference (per-head x @ W_i.T).
    # The kernel computes in bf16 with f32 accumulation -> loose tolerance.
    ok = True
    for o, w, k_i, off in zip(outs, model.weights, nmb_prototypes, model.offsets):
        assert o.shape == (batch, k_i)
        ref = x @ w.T
        ok = ok and bool(jnp.allclose(o.astype(jnp.float32), ref,
                                      atol=5e-2, rtol=5e-2))
        ok = ok and bool(jnp.allclose(fused_tiled[:, off:off + k_i], ref,
                                      atol=5e-2, rtol=5e-2))
    print("KERNEL_OK" if ok else "MISMATCH")
</pallas_src>

<mosaic_0001>
module attributes {stable_mosaic.version = 11 : i64} {
  func.func @_proto_matmul_kernel(%arg0: i32, %arg1: memref<16x64xbf16, #tpu.memory_space<vmem>>, %arg2: memref<64x384xbf16, #tpu.memory_space<vmem>>, %arg3: memref<16x384xf32, #tpu.memory_space<vmem>>) attributes {dimension_semantics = [#tpu.dimension_semantics<parallel>], iteration_bounds = array<i64: 1>, scalar_prefetch = 0 : i64, scratch_operands = 0 : i64, tpu.core_type = #tpu.core_type<tc>, window_params = [{transform_indices = @transform_0, window_bounds = array<i64: 16, 64>}, {pipeline_mode = #tpu.pipeline_mode<synchronous>, transform_indices = @transform_1, window_bounds = array<i64: 64, 384>}, {transform_indices = @transform_2, window_bounds = array<i64: 16, 384>}]} {
    %c0 = arith.constant 0 : index
    %c0_0 = arith.constant 0 : index
    %0 = vector.load %arg1[%c0, %c0_0] : memref<16x64xbf16, #tpu.memory_space<vmem>>, vector<16x64xbf16>
    %c0_1 = arith.constant 0 : index
    %c0_2 = arith.constant 0 : index
    %1 = vector.load %arg2[%c0_1, %c0_2] : memref<64x384xbf16, #tpu.memory_space<vmem>>, vector<64x384xbf16>
    %cst = arith.constant dense<0.000000e+00> : vector<16x384xf32>
    %2 = tpu.matmul %0, %1, %cst {dimension_numbers = #tpu.dot_dimension_numbers<[1], [0], [0], [1], [0, 0, 1, 1], [], []>} : vector<16x64xbf16>, vector<64x384xbf16>, vector<16x384xf32> -> vector<16x384xf32>
    %c0_3 = arith.constant 0 : index
    %c0_4 = arith.constant 0 : index
    %3 = vector.load %arg3[%c0_3, %c0_4] : memref<16x384xf32, #tpu.memory_space<vmem>>, vector<16x384xf32>
    tpu.vector_store %arg3[%c0_3, %c0_4], %2 {strides = array<i32>} : memref<16x384xf32, #tpu.memory_space<vmem>>, vector<16x384xf32>,
    return
  }
  func.func @transform_0(%arg0: i32) -> (i32, i32) {
    %c0_i32 = arith.constant 0 : i32
    %c0_i32_0 = arith.constant 0 : i32
    return %arg0, %c0_i32 : i32, i32
  }
  func.func @transform_1(%arg0: i32) -> (i32, i32) {
    %c0_i32 = arith.constant 0 : i32
    %c0_i32_0 = arith.constant 0 : i32
    %c0_i32_1 = arith.constant 0 : i32
    return %c0_i32, %c0_i32_0 : i32, i32
  }
  func.func @transform_2(%arg0: i32) -> (i32, i32) {
    %c0_i32 = arith.constant 0 : i32
    %c0_i32_0 = arith.constant 0 : i32
    return %arg0, %c0_i32 : i32, i32
  }
}

</mosaic_0001>

<bundles_post_ra>
// kernel: tpu_custom_call.1
= control target key start
LH: loop header
LB: loop body
LE: loop exit
PB: predicated region body
PF: predicated region fallthrough
CT: control target
= control target key end

     0   :  { %7 = vsyncpa [#allocation3], 0  ;;  %s392_s0 = inlined_call_operand.hbm [shape: bf16[16,64], index: 0, kind: input, shape index: {}]   ;;  %s393_s1 = inlined_call_operand.hbm [shape: bf16[64,384], index: 1, kind: input, shape index: {}]   ;;  %s394_s2 = inlined_call_operand.hbm [shape: f32[16,384], index: 2, kind: output, shape index: {}]  }
   0x1   :  { %8 = vsyncpa [#allocation6], 0 }
   0x2   :  { %9 = vsyncpa [#allocation4], 0  ;;  %s14_s11 = sshll.u32 %s392_s0, 4  ;;  %s359_s12 = smov [#allocation2]   ;;  %s15_s11 = int_to_ptr.hbm [resolvable:$true] %s14_s11 }
   0x3   :  { %s16_s13 = sshll.u32 %s359_s12, 4  ;;  %s27_s16 = sshll.u32 %s393_s1, 4  ;;  %s17_s13 = int_to_ptr.vmem [resolvable:$true] %s16_s13  ;;  %s28_s16 = int_to_ptr.hbm [resolvable:$true] %s27_s16 }
   0x4   :  { %s360_s17 = smov 64   ;;  %s361_s18 = smov 4  }
   0x5   :  { %22 = dma.hbm_to_vmem [thread:$0]  %s15_s11, 128, %s17_s13, [#allocation3], %s360_s17, %s360_s17, %s361_s18  }
   0x6   :  { %s362_s19 = smov [#allocation5]   ;;  %s363_s21 = smov 192  }
   0x7   :  { %s29_s20 = sshll.u32 %s362_s19, 4  ;;  %s364_s22 = smov 12   ;;  %s30_s20 = int_to_ptr.vmem [resolvable:$true] %s29_s20 }
   0x8   :  { %35 = dma.hbm_to_vmem [thread:$0]  %s28_s16, 1536, %s30_s20, [#allocation6], %s363_s21, %s363_s21, %s364_s22  }
   0x9   :  { %353 = dma.done.wait [#allocation3], 128  }
   0xa   :  { %354 = vsyncadd [#allocation3], 4294967168 }
   0xb   :  { %355 = dma.done.wait [#allocation6], 1536  }
   0xc   :  { %356 = vsyncadd [#allocation6], 4294965760  ;;  %v246_v0 = vld [vmem:[#allocation5 + $0x48] sm:$0xf]  ;;  %v270_v1 = vld [vmem:[#allocation5 + $0x50] sm:$0xf0] }
   0xd   :  { %v269_v2 = vld [vmem:[#allocation5 + $0x4c] sm:$0xf]  ;;  %v247_v3 = vor.u32 %v270_v1, %v246_v0  ;;  %v248_v4 = vld [vmem:[#allocation5 + $0x54] sm:$0xf0]  ;;  %v254_v5 = vld [vmem:[#allocation5 + $0x50] sm:$0xf] }
   0xe   :  { %v271_v6 = vld [vmem:[#allocation5 + $0x58] sm:$0xf0]  ;;  %v251_v7 = vor.u32 %v269_v2, %v248_v4  ;;  %v234_v9 = vld [vmem:[#allocation5 + $0x30] sm:$0xf]  ;;  %v266_v11 = vld [vmem:[#allocation5 + $0x34] sm:$0xf] }
   0xf   :  { %v255_v8 = vor.u32 %v271_v6, %v254_v5  ;;  %v267_v10 = vld [vmem:[#allocation5 + $0x38] sm:$0xf0]  ;;  %140 = vmatpush.bf16.msra.mxu0 %v247_v3  ;;  %v236_v13 = vld [vmem:[#allocation5 + $0x3c] sm:$0xf0]  ;;  %v242_v14 = vld [vmem:[#allocation5 + $0x38] sm:$0xf] }
  0x10   :  { %v235_v12 = vor.u32 %v267_v10, %v234_v9  ;;  %v268_v15 = vld [vmem:[#allocation5 + $0x40] sm:$0xf0]  ;;  %154 = vmatpush.bf16.msra.mxu1 %v251_v7  ;;  %v239_v16 = vor.u32 %v266_v11, %v236_v13  ;;  %v222_v18 = vld [vmem:[#allocation5 + $0x18] sm:$0xf]  ;;  %v263_v20 = vld [vmem:[#allocation5 + $0x1c] sm:$0xf] }
  0x11   :  { %168 = vmatpush.bf16.msra.mxu2 %v255_v8  ;;  %v243_v17 = vor.u32 %v268_v15, %v242_v14  ;;  %v264_v19 = vld [vmem:[#allocation5 + $0x20] sm:$0xf0]  ;;  %v224_v21 = vld [vmem:[#allocation5 + $0x24] sm:$0xf0]  ;;  %v230_v22 = vld [vmem:[#allocation5 + $0x20] sm:$0xf] }
  0x12   :  { %v265_v23 = vld [vmem:[#allocation5 + $0x28] sm:$0xf0]  ;;  %v223_v24 = vor.u32 %v264_v19, %v222_v18  ;;  %v227_v25 = vor.u32 %v263_v20, %v224_v21  ;;  %v210_v27 = vld [vmem:[#allocation5] sm:$0xf]  ;;  %v260_v29 = vld [vmem:[#allocation5 + $0x4] sm:$0xf] }
  0x13   :  { %141 = vmatpush.bf16.msra.mxu0 %v235_v12  ;;  %v231_v26 = vor.u32 %v265_v23, %v230_v22  ;;  %v261_v28 = vld [vmem:[#allocation5 + $0x8] sm:$0xf0]  ;;  %v212_v30 = vld [vmem:[#allocation5 + $0xc] sm:$0xf0]  ;;  %v218_v31 = vld [vmem:[#allocation5 + $0x8] sm:$0xf] }
  0x14   :  { %155 = vmatpush.bf16.msra.mxu1 %v239_v16  ;;  %v262_v32 = vld [vmem:[#allocation5 + $0x10] sm:$0xf0]  ;;  %v211_v33 = vor.u32 %v261_v28, %v210_v27  ;;  %v215_v34 = vor.u32 %v260_v29, %v212_v30  ;;  %v259_v36 = vld [vmem:[#allocation2] sm:$0xff]  ;;  %vm132_vm0 = vcmask 523264   ;;  %s365_s0 = smov [#allocation7]   ;;  %s190_s25 = sshll.u32 %s394_s2, 4  ;;  %s191_s25 = int_to_ptr.hbm [resolvable:$true] %s190_s25 }
  0x15   :  { %169 = vmatpush.bf16.msra.mxu2 %v243_v17  ;;  %v219_v35 = vor.u32 %v262_v32, %v218_v31  ;;  %s188_s1 = sshll.u32 %s365_s0, 4  ;;  %s366_s26 = smov 384   ;;  %s189_s1 = int_to_ptr.vmem [resolvable:$true] %s188_s1 }
  0x16   :  { %s367_s27 = smov 24  }
  0x17   :  { %142 = vmatpush.bf16.msra.mxu0 %v223_v24 }
  0x18   :  { %156 = vmatpush.bf16.msra.mxu1 %v227_v25 }
  0x19   :  { %170 = vmatpush.bf16.msra.mxu2 %v231_v26 }
  0x1b   :  { %143 = vmatpush.bf16.msra.mxu0 %v211_v33 }
  0x1c   :  { %157 = vmatpush.bf16.msra.mxu1 %v215_v34 }
  0x1d   :  { %171 = vmatpush.bf16.msra.mxu2 %v219_v35 }
  0x1e   :  { %256 = vmatmul.msk.bf16.vlgmr.msra.gmra.mxu0 %vm132_vm0, %v259_v36 }
  0x1f   :  { %257 = vmatmul.msk.bf16.vlgmr.msra.gmra.mxu1 %vm132_vm0, %v259_v36 }
  0x20   :  { %258 = vmatmul.msk.bf16.vlgmr.msra.gmra.mxu2 %vm132_vm0, %v259_v36 }
  0x9b   :  { %v145_v37 = vpop.f32.mrf.mxu0 }
  0x9c   :  { %178 = vst [vmem:[#allocation7] sm:$0xff] %v145_v37  ;;  %v159_v38 = vpop.f32.mrf.mxu1 }
  0x9d   :  { %179 = vst [vmem:[#allocation7 + $0x8] sm:$0xff] %v159_v38 }
  0xa3   :  { %v173_v39 = vpop.f32.mrf.mxu2  ;;  %v147_v40 = vpop.f32.mrf.mxu0 }
  0xa4   :  { %180 = vst [vmem:[#allocation7 + $0x10] sm:$0xff] %v173_v39  ;;  %v161_v41 = vpop.f32.mrf.mxu1 }
  0xa5   :  { %181 = vst [vmem:[#allocation7 + $0x18] sm:$0xff] %v147_v40 }
  0xa6   :  { %182 = vst [vmem:[#allocation7 + $0x20] sm:$0xff] %v161_v41 }
  0xab   :  { %v175_v42 = vpop.f32.mrf.mxu2 }
  0xac   :  { %183 = vst [vmem:[#allocation7 + $0x28] sm:$0xff] %v175_v42 }
  0xad   :  { %196 = dma.vmem_to_hbm [thread:$0]  %s189_s1, 768, %s191_s25, [#allocation4], %s366_s26, %s366_s26, %s367_s27  }
  0xae   :  { %357 = dma.done.wait [#allocation4], 768  }
  0xaf   :  { %358 = vsyncadd [#allocation4], 4294966528 }
  0xb0   :  { %201 = vsyncpa [#allocation3], 1 }
  0xb1   :  { %202 = vsyncpa [#allocation6], 1 }
  0xb2   :  { %203 = vsyncpa [#allocation4], 1 }

</bundles_post_ra>
